<compile_context>
chip_gen: v7x
topology: tpu7x:2x2x1
jax: 0.10.0
libtpu: 0.0.40
codegen_flags: <defaults>
</compile_context>

<pallas_src>
import functools

import jax
import jax.numpy as jnp
from jax.experimental import pallas as pl
from jax.experimental.pallas import tpu as pltpu


def _round_up(x, m):
    return ((x + m - 1) // m) * m


def _choose_batch_tiling(B, feat_row_bytes, target):
    """Pick (TB, nb): TB a multiple of 8, padding B as little as possible."""
    # Keep each (double-buffered) feat tile <= ~8 MiB of VMEM.
    cap = max(8, ((8 << 20) // max(int(feat_row_bytes), 1)) // 8 * 8)
    target = max(8, min(_round_up(int(target), 8), cap))
    B8 = _round_up(B, 8)
    if B8 <= target:
        return B8, 1                       # one tile, minimal padding
    nb = -(-B // target)                   # ceil
    TB = _round_up(-(-B // nb), 8)         # spread B evenly over nb tiles
    return TB, nb


def _default_d_chunks(D):
    """2-way D split only for dual-TensorCore chips and Dc >= 256 lanes."""
    if D < 512 or D % 256 != 0:
        return 1
    try:
        kind = jax.devices()[0].device_kind.lower()
    except Exception:
        return 1
    return 2 if ("v7" in kind or "tpu7" in kind) else 1


def _center_loss_kernel(y_ref, feat_ref, centers_ref, out_ref,
                        cnt_ref, s_ref, *, loss_weight):
    """Grid = (d_chunks [parallel], batch_tiles [arbitrary])."""
    b = pl.program_id(1)
    nb = pl.num_programs(1)

    # ---- init per-class accumulators at the start of each batch sweep ----
    @pl.when(b == 0)
    def _init():
        cnt_ref[...] = jnp.zeros_like(cnt_ref)
        s_ref[...] = jnp.zeros_like(s_ref)

    y = y_ref[...]                                     # (TB, 1) int32 labels
    feat = feat_ref[...].astype(jnp.float32)           # (TB, Dc)
    centers = centers_ref[...]                         # (C, Dc)
    TB = y.shape[0]
    C = centers.shape[0]

    # One-hot built once in the matmul dtype (0/1 is exact in bf16 too).
    # Padded rows carry label == C and match no class -> contribute nothing.
    cls = jax.lax.broadcasted_iota(jnp.int32, (TB, C), 1)
    onehot = (y == cls).astype(centers.dtype)          # (TB, C)

    # Gather per-sample centers with one MXU matmul; direct diff^2 form
    # (numerically robust when features are close to their centers).
    centers_pred = jnp.dot(onehot, centers, preferred_element_type=jnp.float32)
    diff = feat - centers_pred                         # (TB, Dc) f32
    sq = jnp.sum(diff * diff, axis=1, keepdims=True)   # (TB, 1)  f32

    # Per-class statistics on the VPU/XLU (slots idle while the MXU runs).
    oh = onehot.astype(jnp.float32)                    # exact 0/1
    cnt_ref[...] += jnp.sum(oh, axis=0, keepdims=True)         # (1, C) counts
    s_ref[...] += jnp.sum(oh * sq, axis=0, keepdims=True)      # (1, C) sums

    # ---- finalize: loss for this D-chunk -----------------------------------
    @pl.when(b == nb - 1)
    def _finalize():
        inv = pl.reciprocal(cnt_ref[...] + 1.0, approx=True)   # 1/(n_c+1), EUP
        out_ref[...] = (0.5 * loss_weight) * jnp.sum(
            s_ref[...] * inv, axis=1, keepdims=True)           # (1, 1)


def center_loss(y, feat, centers, loss_weight=1.0, *,
                batch_tile=None, d_chunks=None):
    """y: (B,) int labels, feat: (B, D), centers: (C, D) -> scalar f32 loss."""
    B, D = feat.shape
    C, Dc_full = centers.shape
    if Dc_full != D:
        raise ValueError(
            "Center's dim: {0} should be equal to input feature's dim: {1}".format(
                Dc_full, D))

    feat_item = jnp.dtype(feat.dtype).itemsize
    cen_item = jnp.dtype(centers.dtype).itemsize

    # ---- feature-dim chunking (dual-TensorCore chips only) -----------------
    ndc = _default_d_chunks(D) if d_chunks is None else int(d_chunks)
    if ndc != 1 and (D % (128 * ndc) != 0):
        ndc = 1
    DC = D // ndc

    # ---- batch tiling: big tiles, minimal padding ---------------------------
    target = 512 if batch_tile is None else int(batch_tile)
    TB, nb = _choose_batch_tiling(B, DC * feat_item, target)
    B_pad = TB * nb

    # ---- wrapper-side layout (no dtype upcasts) -----------------------------
    # Labels as a column (B_pad, 1); padded slots get label == C (match nothing).
    y_col = jnp.pad(y.astype(jnp.int32).reshape(B, 1),
                    ((0, B_pad - B), (0, 0)), constant_values=C)
    feat_p = feat if B_pad == B else jnp.pad(feat, ((0, B_pad - B), (0, 0)))

    kernel = functools.partial(_center_loss_kernel,
                               loss_weight=float(loss_weight))

    grid_spec = pltpu.PrefetchScalarGridSpec(
        num_scalar_prefetch=0,
        grid=(ndc, nb),
        in_specs=[
            pl.BlockSpec((TB, 1), lambda d, b: (b, 0)),      # labels column
            pl.BlockSpec((TB, DC), lambda d, b: (b, d)),     # streamed feat tile
            pl.BlockSpec((C, DC), lambda d, b: (0, d)),      # centers chunk
        ],
        out_specs=pl.BlockSpec((None, 1, 1), lambda d, b: (d, 0, 0)),
        scratch_shapes=[
            pltpu.VMEM((1, C), jnp.float32),   # n_c : per-class counts
            pltpu.VMEM((1, C), jnp.float32),   # s_c : per-class sum ||diff||^2
        ],
    )

    # Explicit VMEM budget once the working set outgrows the small scoped
    # defaults (16 MiB v5e / 32 MiB v6e, v7x).
    vmem_est = (2 * TB * DC * feat_item            # double-buffered feat tiles
                + 2 * C * DC * cen_item            # double-buffered centers
                + 2 * TB * 4                       # label tiles
                + 2 * 8 * _round_up(C, 128) * 4    # (1, C) scratch (padded)
                + (1 << 20))                       # slack
    vmem_limit = None
    if vmem_est > 12 * (1 << 20):
        vmem_limit = min(int(vmem_est * 1.3), 48 * (1 << 20))

    cost = pl.CostEstimate(
        flops=2 * B_pad * C * D + 6 * B_pad * D,
        transcendentals=ndc * C,
        bytes_accessed=(B_pad * D * feat_item + C * D * cen_item
                        + B_pad * 4 + ndc * 4),
    )

    partial_losses = pl.pallas_call(
        kernel,
        out_shape=jax.ShapeDtypeStruct((ndc, 1, 1), jnp.float32),
        grid_spec=grid_spec,
        compiler_params=pltpu.CompilerParams(
            dimension_semantics=("parallel", "arbitrary"),
            vmem_limit_bytes=vmem_limit),
        cost_estimate=cost,
    )(y_col, feat_p, centers)

    # Sum the (<= 2) per-D-chunk partial losses (division by (n_c+1) is linear
    # in s_c, so per-chunk division stays exact).
    return jnp.sum(partial_losses)


def _reference_center_loss(y, feat, centers, loss_weight=1.0):
    """Pure-JAX reference matching the PyTorch forward."""
    C = centers.shape[0]
    feat = feat.astype(jnp.float32)
    centers = centers.astype(jnp.float32)
    hist = jnp.zeros((C,), jnp.float32).at[y].add(1.0) + 1.0
    centers_count = hist[y]
    diff = feat - centers[y]
    return loss_weight * 0.5 * jnp.sum(jnp.sum(diff ** 2, axis=1) / centers_count)


if __name__ == "__main__":
    key = jax.random.PRNGKey(0)

    # ---- small demo shapes (match the PyTorch module's toy config) --------
    num_classes, feat_dim, batch = 10, 32, 8
    k1, k2, k3, key = jax.random.split(key, 4)
    centers = jax.random.normal(k1, (num_classes, feat_dim), dtype=jnp.float32)
    feat = jax.random.normal(k2, (batch, feat_dim), dtype=jnp.float32)
    y = jax.random.randint(k3, (batch,), 0, num_classes, dtype=jnp.int32)

    loss = jax.block_until_ready(center_loss(y, feat, centers, 1.0))
    ref = _reference_center_loss(y, feat, centers, 1.0)
    assert jnp.allclose(loss, ref, rtol=1e-3, atol=1e-4), (loss, ref)

    # ---- larger case: multi-tile batch sweep with minimal padding
    #      (B=300, batch_tile=128 -> TB=104, nb=3, B_pad=312) ----------------
    C2, D2, B2 = 64, 256, 300
    k1, k2, k3, key = jax.random.split(key, 4)
    centers2 = jax.random.normal(k1, (C2, D2), dtype=jnp.float32)
    feat2 = jax.random.normal(k2, (B2, D2), dtype=jnp.float32)
    y2 = jax.random.randint(k3, (B2,), 0, C2, dtype=jnp.int32)

    ref2 = _reference_center_loss(y2, feat2, centers2, 0.5)

    loss2 = jax.block_until_ready(
        center_loss(y2, feat2, centers2, 0.5, batch_tile=128))
    assert jnp.allclose(loss2, ref2, rtol=1e-3, atol=1e-3), (loss2, ref2)

    # Same case with the default single large tile (TB=304, nb=1).
    loss3 = jax.block_until_ready(center_loss(y2, feat2, centers2, 0.5))
    assert jnp.allclose(loss3, ref2, rtol=1e-3, atol=1e-3), (loss3, ref2)

    print("KERNEL_OK")
</pallas_src>

<mosaic_0001>
module attributes {stable_mosaic.version = 11 : i64} {
  func.func @_center_loss_kernel(%arg0: i32, %arg1: i32, %arg2: memref<8x1xi32, #tpu.memory_space<vmem>>, %arg3: memref<8x32xf32, #tpu.memory_space<vmem>>, %arg4: memref<10x32xf32, #tpu.memory_space<vmem>>, %arg5: memref<1x1x1xf32, #tpu.memory_space<vmem>>, %arg6: memref<1x10xf32, #tpu.memory_space<vmem>>, %arg7: memref<1x10xf32, #tpu.memory_space<vmem>>) attributes {dimension_semantics = [#tpu.dimension_semantics<parallel>, #tpu.dimension_semantics<arbitrary>], iteration_bounds = array<i64: 1, 1>, scalar_prefetch = 0 : i64, scratch_operands = 2 : i64, tpu.core_type = #tpu.core_type<tc>, window_params = [{transform_indices = @transform_0, window_bounds = array<i64: 8, 1>}, {transform_indices = @transform_1, window_bounds = array<i64: 8, 32>}, {transform_indices = @transform_2, window_bounds = array<i64: 10, 32>}, {transform_indices = @transform_3, window_bounds = array<i64: 1, 1, 1>}]} {
    %c0_i32 = arith.constant 0 : i32
    %0 = arith.cmpi eq, %arg1, %c0_i32 : i32
    %1 = arith.extui %0 : i1 to i32
    %c0_i32_0 = arith.constant 0 : i32
    %2 = arith.cmpi ne, %1, %c0_i32_0 : i32
    scf.if %2 {
      %cst_19 = arith.constant 0.000000e+00 : f32
      %31 = vector.broadcast %cst_19 : f32 to vector<1x10xf32>
      %c0_20 = arith.constant 0 : index
      %c0_21 = arith.constant 0 : index
      %32 = vector.load %arg6[%c0_20, %c0_21] : memref<1x10xf32, #tpu.memory_space<vmem>>, vector<1x10xf32>
      tpu.vector_store %arg6[%c0_20, %c0_21], %31 {strides = array<i32>} : memref<1x10xf32, #tpu.memory_space<vmem>>, vector<1x10xf32>,
      %cst_22 = arith.constant 0.000000e+00 : f32
      %33 = vector.broadcast %cst_22 : f32 to vector<1x10xf32>
      %c0_23 = arith.constant 0 : index
      %c0_24 = arith.constant 0 : index
      %34 = vector.load %arg7[%c0_23, %c0_24] : memref<1x10xf32, #tpu.memory_space<vmem>>, vector<1x10xf32>
      tpu.vector_store %arg7[%c0_23, %c0_24], %33 {strides = array<i32>} : memref<1x10xf32, #tpu.memory_space<vmem>>, vector<1x10xf32>,
    } else {
    }
    %c0 = arith.constant 0 : index
    %c0_1 = arith.constant 0 : index
    %3 = vector.load %arg2[%c0, %c0_1] : memref<8x1xi32, #tpu.memory_space<vmem>>, vector<8x1xi32>
    %c0_2 = arith.constant 0 : index
    %c0_3 = arith.constant 0 : index
    %4 = vector.load %arg3[%c0_2, %c0_3] : memref<8x32xf32, #tpu.memory_space<vmem>>, vector<8x32xf32>
    %c0_4 = arith.constant 0 : index
    %c0_5 = arith.constant 0 : index
    %5 = vector.load %arg4[%c0_4, %c0_5] : memref<10x32xf32, #tpu.memory_space<vmem>>, vector<10x32xf32>
    %6 = tpu.iota {dimensions = array<i32: 1>} : vector<8x10xi32>
    %7 = vector.broadcast %3 : vector<8x1xi32> to vector<8x10xi32>
    %8 = arith.cmpi eq, %7, %6 : vector<8x10xi32>
    %9 = arith.extui %8 : vector<8x10xi1> to vector<8x10xi32>
    %10 = arith.sitofp %9 : vector<8x10xi32> to vector<8x10xf32>
    %cst = arith.constant dense<0.000000e+00> : vector<8x32xf32>
    %11 = tpu.matmul %10, %5, %cst {dimension_numbers = #tpu.dot_dimension_numbers<[1], [0], [0], [1], [0, 0, 1, 1], [], []>} : vector<8x10xf32>, vector<10x32xf32>, vector<8x32xf32> -> vector<8x32xf32>
    %12 = arith.subf %4, %11 : vector<8x32xf32>
    %13 = arith.mulf %12, %12 : vector<8x32xf32>
    %cst_6 = arith.constant dense<0.000000e+00> : vector<8xf32>
    %14 = vector.multi_reduction <add>, %13, %cst_6 [1] : vector<8x32xf32> to vector<8xf32>
    %15 = vector.shape_cast %14 : vector<8xf32> to vector<8x1xf32>
    %c0_7 = arith.constant 0 : index
    %c0_8 = arith.constant 0 : index
    %16 = vector.load %arg6[%c0_7, %c0_8] : memref<1x10xf32, #tpu.memory_space<vmem>>, vector<1x10xf32>
    %cst_9 = arith.constant dense<0.000000e+00> : vector<10xf32>
    %17 = vector.multi_reduction <add>, %10, %cst_9 [0] : vector<8x10xf32> to vector<10xf32>
    %18 = vector.shape_cast %17 : vector<10xf32> to vector<1x10xf32>
    %19 = arith.addf %16, %18 : vector<1x10xf32>
    %c0_10 = arith.constant 0 : index
    %c0_11 = arith.constant 0 : index
    %20 = vector.load %arg6[%c0_10, %c0_11] : memref<1x10xf32, #tpu.memory_space<vmem>>, vector<1x10xf32>
    tpu.vector_store %arg6[%c0_10, %c0_11], %19 {strides = array<i32>} : memref<1x10xf32, #tpu.memory_space<vmem>>, vector<1x10xf32>,
    %c0_12 = arith.constant 0 : index
    %c0_13 = arith.constant 0 : index
    %21 = vector.load %arg7[%c0_12, %c0_13] : memref<1x10xf32, #tpu.memory_space<vmem>>, vector<1x10xf32>
    %22 = vector.broadcast %15 : vector<8x1xf32> to vector<8x10xf32>
    %23 = arith.mulf %10, %22 : vector<8x10xf32>
    %cst_14 = arith.constant dense<0.000000e+00> : vector<10xf32>
    %24 = vector.multi_reduction <add>, %23, %cst_14 [0] : vector<8x10xf32> to vector<10xf32>
    %25 = vector.shape_cast %24 : vector<10xf32> to vector<1x10xf32>
    %26 = arith.addf %21, %25 : vector<1x10xf32>
    %c0_15 = arith.constant 0 : index
    %c0_16 = arith.constant 0 : index
    %27 = vector.load %arg7[%c0_15, %c0_16] : memref<1x10xf32, #tpu.memory_space<vmem>>, vector<1x10xf32>
    tpu.vector_store %arg7[%c0_15, %c0_16], %26 {strides = array<i32>} : memref<1x10xf32, #tpu.memory_space<vmem>>, vector<1x10xf32>,
    %c0_i32_17 = arith.constant 0 : i32
    %28 = arith.cmpi eq, %arg1, %c0_i32_17 : i32
    %29 = arith.extui %28 : i1 to i32
    %c0_i32_18 = arith.constant 0 : i32
    %30 = arith.cmpi ne, %29, %c0_i32_18 : i32
    scf.if %30 {
      %c0_19 = arith.constant 0 : index
      %c0_20 = arith.constant 0 : index
      %31 = vector.load %arg6[%c0_19, %c0_20] : memref<1x10xf32, #tpu.memory_space<vmem>>, vector<1x10xf32>
      %cst_21 = arith.constant 1.000000e+00 : f32
      %32 = vector.broadcast %cst_21 : f32 to vector<1x10xf32>
      %33 = arith.addf %31, %32 : vector<1x10xf32>
      %34 = tpu.reciprocal %33 {approx = true} : vector<1x10xf32> -> vector<1x10xf32>
      %c0_22 = arith.constant 0 : index
      %c0_23 = arith.constant 0 : index
      %35 = vector.load %arg7[%c0_22, %c0_23] : memref<1x10xf32, #tpu.memory_space<vmem>>, vector<1x10xf32>
      %36 = arith.mulf %35, %34 : vector<1x10xf32>
      %cst_24 = arith.constant dense<0.000000e+00> : vector<1xf32>
      %37 = vector.multi_reduction <add>, %36, %cst_24 [1] : vector<1x10xf32> to vector<1xf32>
      %38 = vector.shape_cast %37 : vector<1xf32> to vector<1x1xf32>
      %cst_25 = arith.constant 5.000000e-01 : f32
      %39 = vector.broadcast %cst_25 : f32 to vector<1x1xf32>
      %40 = arith.mulf %39, %38 : vector<1x1xf32>
      %c0_26 = arith.constant 0 : index
      %c0_27 = arith.constant 0 : index
      %c0_28 = arith.constant 0 : index
      %41 = vector.load %arg5[%c0_26, %c0_27, %c0_28] : memref<1x1x1xf32, #tpu.memory_space<vmem>>, vector<1x1x1xf32>
      %42 = vector.shape_cast %41 : vector<1x1x1xf32> to vector<1x1xf32>
      %43 = vector.shape_cast %40 : vector<1x1xf32> to vector<1x1x1xf32>
      tpu.vector_store %arg5[%c0_26, %c0_27, %c0_28], %43 {strides = array<i32>} : memref<1x1x1xf32, #tpu.memory_space<vmem>>, vector<1x1x1xf32>,
    } else {
    }
    return
  }
  func.func @transform_0(%arg0: i32, %arg1: i32) -> (i32, i32) {
    %c0_i32 = arith.constant 0 : i32
    %c0_i32_0 = arith.constant 0 : i32
    return %arg1, %c0_i32 : i32, i32
  }
  func.func @transform_1(%arg0: i32, %arg1: i32) -> (i32, i32) {
    %c0_i32 = arith.constant 0 : i32
    return %arg1, %arg0 : i32, i32
  }
  func.func @transform_2(%arg0: i32, %arg1: i32) -> (i32, i32) {
    %c0_i32 = arith.constant 0 : i32
    %c0_i32_0 = arith.constant 0 : i32
    return %c0_i32, %arg0 : i32, i32
  }
  func.func @transform_3(%arg0: i32, %arg1: i32) -> (i32, i32, i32) {
    %c0_i32 = arith.constant 0 : i32
    %c0_i32_0 = arith.constant 0 : i32
    %c0_i32_1 = arith.constant 0 : i32
    return %arg0, %c0_i32, %c0_i32_0 : i32, i32, i32
  }
}

</mosaic_0001>

<bundles_post_ra>
// kernel: tpu_custom_call.1
= control target key start
LH: loop header
LB: loop body
LE: loop exit
PB: predicated region body
PF: predicated region fallthrough
CT: control target
= control target key end

     0   :  { %8 = vsyncpa [#allocation5], 0  ;;  %s324_s0 = inlined_call_operand.vmem [shape: s32[8,1], index: 0, kind: input, shape index: {}]   ;;  %s325_s1 = inlined_call_operand.hbm [shape: f32[8,32], index: 1, kind: input, shape index: {}]   ;;  %s326_s2 = inlined_call_operand.vmem [shape: f32[10,32], index: 2, kind: input, shape index: {}]   ;;  %s327_s3 = inlined_call_operand.hbm [shape: f32[1,1,1], index: 3, kind: output, shape index: {}]  }
   0x1   :  { %9 = vsyncpa [#allocation6], 0  ;;  %s256_s12 = smov [#allocation4]   ;;  %s208_s16 = scalar_lea.hbm %s325_s1, 128 }
   0x2   :  { %s18_s13 = sshll.u32 %s256_s12, 4  ;;  %p209_p0 = scmp.ne.s32.totalorder %s325_s1, %s208_s16  ;;  %s19_s13 = int_to_ptr.vmem [resolvable:$true] %s18_s13 }
   0x3   :  { %p212_p1 = scmp.lt.u32.totalorder %s208_s16, %s325_s1 }
   0x5   :  { %p214_p2 = pnand %p212_p1, %p209_p0 }
   0x7   :  { %217 = shalt.err (!%p214_p2)
}
   0x8   :  { %s218_s21 = scalar_lea.vmem %s19_s13, 128  ;;  %p223_p4 = scmp.lt.s32.totalorder %s19_s13, %s19_s13 }
   0x9   :  { %p219_p3 = scmp.ne.s32.totalorder %s19_s13, %s218_s21  ;;  %p224_p5 = scmp.lt.s32.totalorder %s218_s21, %s218_s21 }
   0xb   :  { %p225_p6 = por %p224_p5, %p223_p4 }
   0xd   :  { %p226_p7 = pnand %p225_p6, %p219_p3 }
   0xf   :  { %229 = shalt.err (!%p226_p7)
}
  0x10   :  { %21 = dma.hbm_to_vmem [thread:$0]  %s325_s1, 128, %s19_s13, [#allocation5]  }
  0x11   :  { %252 = dma.done.wait [#allocation5], 128  }
  0x12   :  { %253 = vsyncadd [#allocation5], 4294967168  ;;  %v257_v0 = vmov 0   ;;  %v258_v1 = vmov 0.0|0.0   ;;  %vm50_vm0 = vcmask 1041408   ;;  %vm259_vm1 = vmmov 1  }
  0x13   :  { %205 = vset.pattern.permute.xlu0 %v257_v0  ;;  %194 = vmatprep.subr.bf16.mxu0 %v258_v1  ;;  %vm196_vm2 = vmpackc.low %vm50_vm0, %vm259_vm1  ;;  %v34_v2 = vld [vmem:[%s324_s0] sm:$0xff]  ;;  %v37_v4 = vld [vmem:[%s326_s2 + $0x8] sm:$0x3]  ;;  %vm260_vm3 = vmmov 0   ;;  %v261_v6 = vmov 0.0   ;;  %vm31_vm4 = vcmask 73728   ;;  %v38_v7 = vlaneseq }
  0x14   :  { %v36_v3 = vld [vmem:[%s326_s2] sm:$0xff]  ;;  %41 = vperm.xlu0 %205, %v34_v2   ;;  %191 = vmatprep.mubr.msk.f32.mxu0 %vm260_vm3, %v261_v6  ;;  %32 = vst.msk [vmem:[#allocation2] sm:$0x1] %vm31_vm4, %v261_v6  ;;  %33 = vst.msk [vmem:[#allocation3] sm:$0x1] %vm31_vm4, %v261_v6  ;;  %vm46_vm5 = vcmask 80896  }
  0x15   :  { %v195_v5 = vpack.c.bf16 %v37_v4, %v36_v3  ;;  %v39_v8 = vand.u32 127, %v38_v7  ;;  %v35_v20 = vld [vmem:[#allocation4] sm:$0xff]  ;;  %vm126_vm7 = vcmask 261120   ;;  %s262_s0 = smov [#allocation7]   ;;  %vm164_vm8 = vcmask 0  }
  0x16   :  { %s172_s1 = sshll.u32 %s262_s0, 4  ;;  %s173_s1 = int_to_ptr.vmem [resolvable:$true] %s172_s1 }
  0x17   :  { %197 = vmatpush3.bf16.msk.msra.mxu0 %vm196_vm2, %v195_v5  ;;  %s230_s2 = scalar_lea.vmem %s173_s1, 16  ;;  %s234_s30 = scalar_lea.vmem %s173_s1, 32 }
  0x18   :  { %p231_p8 = scmp.ne.s32.totalorder %s173_s1, %s230_s2  ;;  %p235_p9 = scmp.lt.s32.totalorder %s173_s1, %s173_s1 }
  0x19   :  { %p236_p10 = scmp.lt.s32.totalorder %s234_s30, %s230_s2 }
  0x1b   :  { %v130_v17 = vld [vmem:[#allocation2] sm:$0x1]  ;;  %v141_v36 = vld [vmem:[#allocation3] sm:$0x1]  ;;  %p237_p11 = por %p236_p10, %p235_p9 }
  0x1d   :  { %p238_p12 = pnand %p237_p11, %p231_p8 }
  0x93   :  { %v42_v9 = vpop.permute.xlu0 %41 }
  0x94   :  { %vm43_vm6 = vcmp.eq.s32.totalorder %v42_v9, %v39_v8 }
  0x95   :  { %v181_v10 = vsel %vm43_vm6, 1.0, %v261_v6 }
  0x96   :  { %192 = vmatmul.mubr.msk.f32.vlgmr.msra.gmra.mrb[0].mxu0 %vm46_vm5, %v181_v10  ;;  %v131_v11 = vsel %vm46_vm5, %v181_v10, 0.0 }
  0x97   :  { %v132_v12 = vrot.slane %v131_v11, 4 }
  0x99   :  { %v133_v13 = vadd.f32 %v132_v12, %v131_v11 }
  0x9b   :  { %v134_v14 = vrot.slane %v133_v13, 2 }
  0x9d   :  { %v135_v15 = vadd.f32 %v134_v14, %v133_v13 }
  0x9f   :  { %v136_v16 = vrot.slane %v135_v15, 1 }
  0xa1   :  { %v137_v18 = vadd.f32 %v136_v16, %v135_v15 }
  0xa3   :  { %v138_v19 = vadd.f32 %v137_v18, %v130_v17 }
  0xa5   :  { %140 = vst.msk [vmem:[#allocation2] sm:$0x1] %vm31_vm4, %v138_v19 }
  0xac   :  { %v155_v32 = vld [vmem:[#allocation2] sm:$0x1] }
  0xad   :  { %v156_v34 = vadd.f32 1.0, %v155_v32 }
  0xaf   :  { %206 = vrcp.f32 %v156_v34 }
  0xb9   :  { %v207_v39 = vpop.eup %206 }
 0x169   :  { %v120_v21 = vpop.f32.mrb[0].mxu0 }
 0x16a   :  { %v124_v22 = vsub.f32 %v35_v20, %v120_v21  ;;  %v193_v23 = vpop.f32.mrb[1].mxu0 }
 0x16c   :  { %v125_v24 = vmul.f32 %v124_v22, %v124_v22 }
 0x16e   :  { %v127_v25 = vsel %vm126_vm7, %v125_v24, 0.0 }
 0x16f   :  { %128 = vadd.xlane.f32.xlu0 %v127_v25 }
 0x1fc   :  { %v129_v26 = vpop.xlane.xlu0 %128 }
 0x1fd   :  { %v142_v27 = vmul.f32 %v181_v10, %v129_v26 }
 0x1ff   :  { %v143_v28 = vsel %vm46_vm5, %v142_v27, 0.0 }
 0x200   :  { %v144_v29 = vrot.slane %v143_v28, 4 }
 0x202   :  { %v145_v30 = vadd.f32 %v144_v29, %v143_v28 }
 0x204   :  { %v146_v31 = vrot.slane %v145_v30, 2 }
 0x206   :  { %v147_v33 = vadd.f32 %v146_v31, %v145_v30 }
 0x208   :  { %v148_v35 = vrot.slane %v147_v33, 1 }
 0x20a   :  { %v149_v37 = vadd.f32 %v148_v35, %v147_v33 }
 0x20c   :  { %v150_v38 = vadd.f32 %v149_v37, %v141_v36 }
 0x20e   :  { %151 = vst.msk [vmem:[#allocation3] sm:$0x1] %vm31_vm4, %v150_v38 }
 0x215   :  { %v158_v40 = vld [vmem:[#allocation3] sm:$0x1] }
 0x216   :  { %v159_v41 = vmul.f32 %v207_v39, %v158_v40 }
 0x218   :  { %v160_v42 = vsel %vm31_vm4, %v159_v41, 0.0 }
 0x219   :  { %161 = vadd.xlane.f32.xlu1 %v160_v42 }
 0x2a6   :  { %v162_v43 = vpop.xlane.xlu1 %161 }
 0x2a7   :  { %v163_v44 = vmul.f32 0.5, %v162_v43 }
 0x2a9   :  { %165 = vst.msk [vmem:[#allocation7] sm:$0x1] %vm164_vm8, %v163_v44 }
 0x2aa   :  { %241 = shalt.err (!%p238_p12)
}
 0x2ab   :  { %s242_s6 = scalar_lea.hbm %s327_s3, 16 }
 0x2ac   :  { %p243_p13 = scmp.ne.s32.totalorder %s327_s3, %s242_s6  ;;  %p246_p0 = scmp.lt.u32.totalorder %s242_s6, %s327_s3 }
 0x2ae   :  { %p248_p1 = pnand %p246_p0, %p243_p13 }
 0x2b0   :  { %251 = shalt.err (!%p248_p1)
}
 0x2b1   :  { %175 = dma.vmem_to_hbm [thread:$0]  %s173_s1, 16, %s327_s3, [#allocation6]  }
 0x2b2   :  { %254 = dma.done.wait [#allocation6], 16  }
 0x2b3   :  { %255 = vsyncadd [#allocation6], 4294967280 }
 0x2b4   :  { %179 = vsyncpa [#allocation5], 1 }
 0x2b5   :  { %180 = vsyncpa [#allocation6], 1 }

</bundles_post_ra>
